<compile_context>
chip_gen: v6e
topology: v6e:2x2x1
jax: 0.10.0
libtpu: 0.0.40
codegen_flags: <defaults>
</compile_context>

<pallas_src>
import functools

import jax
import jax.numpy as jnp
from jax.experimental import pallas as pl
from jax.experimental.pallas import tpu as pltpu


# Index of each projection in the stacked weight/bias tensors.
_N2N, _N2E, _E2E, _E2N, _E2T, _T2T, _T2E = range(7)


# ----------------------------- kernel -----------------------------------------

def _planetoid_scconv_kernel(x0_ref, x1_ref, x2_ref,   # [N0,F] [N1,F] [N2,F]
                             w_ref, b_ref,             # [7,F,OUT] [7,1,OUT]
                             a0_ref,                   # [N0, N0+N1]   = [L0 | D1invB1]
                             a1_ref,                   # [N1, N1+N0+N2]= [L1 | D2B1TD1inv | B2D3]
                             a2_ref,                   # [N2, N2+N1]   = [L2 | B2TD2inv]
                             b1_ref, b2_ref,           # [N0,N1] [N1,N2]
                             wtri_ref, btri_ref,       # [OUT,OUT] [1,OUT]
                             alpha_ref,                # [1,1] PReLU weight
                             o_ref):                   # [N0, OUT]
    f32 = jnp.float32
    alpha = alpha_ref[...]                             # (1,1), broadcasts

    def prelu(x):
        return jnp.where(x >= 0.0, x, alpha * x)

    def proj(x, idx):
        # X @ W_idx + b_idx with f32 accumulation on the MXU.
        return jnp.dot(x, w_ref[idx], preferred_element_type=f32) + b_ref[idx]

    x0 = x0_ref[...]
    x1 = x1_ref[...]
    x2 = x2_ref[...]

    # ---- stage 1: the 7 Linear projections (small K = num feats) ----------
    p_n2n = proj(x0, _N2N)
    p_n2e = proj(x0, _N2E)
    p_e2e = proj(x1, _E2E)
    p_e2n = proj(x1, _E2N)
    p_e2t = proj(x1, _E2T)
    p_t2t = proj(x2, _T2T)
    p_t2e = proj(x2, _T2E)

    # ---- stage 2: one stacked operator matmul per simplicial degree -------
    y0 = jnp.concatenate([p_n2n, p_e2n], axis=0)            # [N0+N1, OUT]
    x0_mid = 0.5 * prelu(jnp.dot(a0_ref[...], y0, preferred_element_type=f32))

    y1 = jnp.concatenate([p_e2e, p_n2e, p_t2e], axis=0)     # [N1+N0+N2, OUT]
    x1_mid = (1.0 / 3.0) * prelu(
        jnp.dot(a1_ref[...], y1, preferred_element_type=f32))

    y2 = jnp.concatenate([p_t2t, p_e2t], axis=0)            # [N2+N1, OUT]
    x2_mid = 0.5 * prelu(jnp.dot(a2_ref[...], y2, preferred_element_type=f32))

    # ---- stage 3: Planetoid head ------------------------------------------
    tri = jnp.dot(b2_ref[...], x2_mid, preferred_element_type=f32)
    tri = jnp.dot(tri, wtri_ref[...], preferred_element_type=f32) + btri_ref[...]
    # B1 @ X1 + B1 @ tri(...)  ==  B1 @ (X1 + tri(...))   -> one MXU pass saved
    agg = jnp.dot(b1_ref[...], x1_mid + tri, preferred_element_type=f32)
    o_ref[...] = (x0_mid + agg) * (1.0 / 3.0)


# ----------------------------- wrapper -----------------------------------------

def _full_block(shape):
    # Whole array as a single block (block == array dims, so the (8,128)
    # divisibility rule does not apply).
    return pl.BlockSpec(shape, lambda i: (0,) * len(shape))


def planetoid_scconv_forward(params, X0, edges, triangles,
                             L0, L1, L2, B1, B2,
                             B2D3, D2B1TD1inv, D1invB1, B2TD2inv):
    """Forward of PlanetoidSCConv as one fused Pallas kernel."""
    f32 = jnp.float32

    # --- preprocessing: binarize X0, derive edge / triangle features --------
    # TODO(synk): X0[edge_idx] / X0[tri_idx] row gathers are data-dependent;
    # they stay in plain JAX (a Pallas scalar-prefetch/DMA gather only pays off
    # at real graph scale).
    X0b = (X0 != 0).astype(f32)
    X1f = jnp.logical_and(X0b[edges[:, 0]], X0b[edges[:, 1]]).astype(f32)
    X2f = jnp.logical_and(
        X0b[triangles[:, 0]],
        jnp.logical_and(X0b[triangles[:, 1]], X0b[triangles[:, 2]])).astype(f32)

    out_size = params["n2n_w"].shape[1]
    N0 = X0.shape[0]

    # --- operand prep (pure layout stacking, no arithmetic) -----------------
    order = ("n2n", "n2e", "e2e", "e2n", "e2t", "t2t", "t2e")
    Wall = jnp.stack([params[k + "_w"] for k in order])            # [7, F, OUT]
    Ball = jnp.stack([params[k + "_b"][None, :] for k in order])   # [7, 1, OUT]

    A0 = jnp.concatenate([L0, D1invB1], axis=1)                    # [N0, N0+N1]
    A1 = jnp.concatenate([L1, D2B1TD1inv, B2D3], axis=1)           # [N1, N1+N0+N2]
    A2 = jnp.concatenate([L2, B2TD2inv], axis=1)                   # [N2, N2+N1]

    Wtri = params["tri_w"]
    btri = params["tri_b"][None, :]
    alpha = params["prelu_w"].reshape(1, 1).astype(f32)

    operands = (X0b, X1f, X2f, Wall, Ball, A0, A1, A2, B1, B2,
                Wtri, btri, alpha)

    # TODO(synk): at real Planetoid scale (Cora/Pubmed) the dense L operators do
    # not fit a single VMEM block (v7x: 64 MiB physical); row-tile A0/A1/A2 with
    # a grid over output rows ("parallel" for v7x's two TensorCores), use a VMEM
    # f32 accumulator, and set vmem_limit_bytes explicitly.
    return pl.pallas_call(
        _planetoid_scconv_kernel,
        out_shape=jax.ShapeDtypeStruct((N0, out_size), f32),
        grid=(1,),
        in_specs=[_full_block(op.shape) for op in operands],
        out_specs=_full_block((N0, out_size)),
        compiler_params=pltpu.CompilerParams(
            dimension_semantics=("arbitrary",)),
    )(*operands)


# ----------------------------- reference (plain JAX) ---------------------------

def planetoid_scconv_reference(params, X0, edges, triangles,
                               L0, L1, L2, B1, B2,
                               B2D3, D2B1TD1inv, D1invB1, B2TD2inv):
    f32 = jnp.float32
    X0b = (X0 != 0).astype(f32)
    X1f = jnp.logical_and(X0b[edges[:, 0]], X0b[edges[:, 1]]).astype(f32)
    X2f = jnp.logical_and(
        X0b[triangles[:, 0]],
        jnp.logical_and(X0b[triangles[:, 1]], X0b[triangles[:, 2]])).astype(f32)

    a = params["prelu_w"][0]
    prelu = lambda x: jnp.where(x >= 0.0, x, a * x)
    lin = lambda x, wk, bk: x @ params[wk] + params[bk]

    n2n = L0 @ lin(X0b, "n2n_w", "n2n_b")
    n2e = D2B1TD1inv @ lin(X0b, "n2e_w", "n2e_b")
    e2n = D1invB1 @ lin(X1f, "e2n_w", "e2n_b")
    e2e = L1 @ lin(X1f, "e2e_w", "e2e_b")
    e2t = B2TD2inv @ lin(X1f, "e2t_w", "e2t_b")
    t2t = L2 @ lin(X2f, "t2t_w", "t2t_b")
    t2e = B2D3 @ lin(X2f, "t2e_w", "t2e_b")

    X0o = 0.5 * prelu(n2n + e2n)
    X1o = (1.0 / 3.0) * prelu(e2e + n2e + t2e)
    X2o = 0.5 * prelu(t2t + e2t)

    tri = (B2 @ X2o) @ params["tri_w"] + params["tri_b"]
    return (X0o + B1 @ X1o + B1 @ tri) / 3.0


# ----------------------------- main --------------------------------------------

if __name__ == "__main__":
    # Small simplicial complex: 16 nodes, 32 edges, 8 triangles.
    N0, N1, N2 = 16, 32, 8
    F = 4            # num_node_feats (== edge/triangle feat dim in this model)
    OUT = 32         # output_size

    key = jax.random.PRNGKey(0)
    ks = jax.random.split(key, 32)

    def rnd(k, shape, s=0.1):
        return jax.random.normal(k, shape, jnp.float32) * s

    # Linear weights stored as [in_feats, out_size] (transposed vs torch
    # nn.Linear.weight), biases as [out_size]; PReLU weight scalar (torch init).
    params = {
        "n2n_w": rnd(ks[0], (F, OUT)),  "n2n_b": rnd(ks[1], (OUT,)),
        "n2e_w": rnd(ks[2], (F, OUT)),  "n2e_b": rnd(ks[3], (OUT,)),
        "e2e_w": rnd(ks[4], (F, OUT)),  "e2e_b": rnd(ks[5], (OUT,)),
        "e2n_w": rnd(ks[6], (F, OUT)),  "e2n_b": rnd(ks[7], (OUT,)),
        "e2t_w": rnd(ks[8], (F, OUT)),  "e2t_b": rnd(ks[9], (OUT,)),
        "t2t_w": rnd(ks[10], (F, OUT)), "t2t_b": rnd(ks[11], (OUT,)),
        "t2e_w": rnd(ks[12], (F, OUT)), "t2e_b": rnd(ks[13], (OUT,)),
        "tri_w": rnd(ks[14], (OUT, OUT)), "tri_b": rnd(ks[15], (OUT,)),
        "prelu_w": jnp.array([0.25], jnp.float32),
    }

    # Node features with genuine zeros so the (X0 != 0) binarization matters.
    mask = jax.random.bernoulli(ks[16], 0.6, (N0, F))
    X0 = jnp.where(mask, jax.random.normal(ks[17], (N0, F), jnp.float32), 0.0)

    # Edge / triangle -> node index tables.
    edges = jax.random.randint(ks[18], (N1, 2), 0, N0, jnp.int32)
    triangles = jax.random.randint(ks[19], (N2, 3), 0, N0, jnp.int32)

    # Operators (torch.sparse matrices materialized dense).
    L0 = rnd(ks[20], (N0, N0))
    L1 = rnd(ks[21], (N1, N1))
    L2 = rnd(ks[22], (N2, N2))
    B1 = rnd(ks[23], (N0, N1))
    B2 = rnd(ks[24], (N1, N2))
    B2D3 = rnd(ks[25], (N1, N2))
    D2B1TD1inv = rnd(ks[26], (N1, N0))
    D1invB1 = rnd(ks[27], (N0, N1))
    B2TD2inv = rnd(ks[28], (N2, N1))

    args = (X0, edges, triangles, L0, L1, L2, B1, B2,
            B2D3, D2B1TD1inv, D1invB1, B2TD2inv)

    fwd = jax.jit(planetoid_scconv_forward)
    out = jax.block_until_ready(fwd(params, *args))
    ref = jax.block_until_ready(planetoid_scconv_reference(params, *args))

    assert out.shape == (N0, OUT) and out.dtype == jnp.float32
    assert jnp.allclose(out, ref, atol=2e-5, rtol=2e-5), \
        float(jnp.max(jnp.abs(out - ref)))

    print("KERNEL_OK")
</pallas_src>

<mosaic_0001>
module attributes {stable_mosaic.version = 11 : i64} {
  func.func @_planetoid_scconv_kernel(%arg0: i32, %arg1: memref<16x4xf32, #tpu.memory_space<vmem>>, %arg2: memref<32x4xf32, #tpu.memory_space<vmem>>, %arg3: memref<8x4xf32, #tpu.memory_space<vmem>>, %arg4: memref<7x4x32xf32, #tpu.memory_space<vmem>>, %arg5: memref<7x1x32xf32, #tpu.memory_space<vmem>>, %arg6: memref<16x48xf32, #tpu.memory_space<vmem>>, %arg7: memref<32x56xf32, #tpu.memory_space<vmem>>, %arg8: memref<8x40xf32, #tpu.memory_space<vmem>>, %arg9: memref<16x32xf32, #tpu.memory_space<vmem>>, %arg10: memref<32x8xf32, #tpu.memory_space<vmem>>, %arg11: memref<32x32xf32, #tpu.memory_space<vmem>>, %arg12: memref<1x32xf32, #tpu.memory_space<vmem>>, %arg13: memref<1x1xf32, #tpu.memory_space<vmem>>, %arg14: memref<16x32xf32, #tpu.memory_space<vmem>>) attributes {dimension_semantics = [#tpu.dimension_semantics<arbitrary>], iteration_bounds = array<i64: 1>, scalar_prefetch = 0 : i64, scratch_operands = 0 : i64, tpu.core_type = #tpu.core_type<tc>, window_params = [{pipeline_mode = #tpu.pipeline_mode<synchronous>, transform_indices = @transform_0, window_bounds = array<i64: 16, 4>}, {pipeline_mode = #tpu.pipeline_mode<synchronous>, transform_indices = @transform_1, window_bounds = array<i64: 32, 4>}, {pipeline_mode = #tpu.pipeline_mode<synchronous>, transform_indices = @transform_2, window_bounds = array<i64: 8, 4>}, {pipeline_mode = #tpu.pipeline_mode<synchronous>, transform_indices = @transform_3, window_bounds = array<i64: 7, 4, 32>}, {pipeline_mode = #tpu.pipeline_mode<synchronous>, transform_indices = @transform_4, window_bounds = array<i64: 7, 1, 32>}, {pipeline_mode = #tpu.pipeline_mode<synchronous>, transform_indices = @transform_5, window_bounds = array<i64: 16, 48>}, {pipeline_mode = #tpu.pipeline_mode<synchronous>, transform_indices = @transform_6, window_bounds = array<i64: 32, 56>}, {pipeline_mode = #tpu.pipeline_mode<synchronous>, transform_indices = @transform_7, window_bounds = array<i64: 8, 40>}, {pipeline_mode = #tpu.pipeline_mode<synchronous>, transform_indices = @transform_8, window_bounds = array<i64: 16, 32>}, {pipeline_mode = #tpu.pipeline_mode<synchronous>, transform_indices = @transform_9, window_bounds = array<i64: 32, 8>}, {pipeline_mode = #tpu.pipeline_mode<synchronous>, transform_indices = @transform_10, window_bounds = array<i64: 32, 32>}, {pipeline_mode = #tpu.pipeline_mode<synchronous>, transform_indices = @transform_11, window_bounds = array<i64: 1, 32>}, {pipeline_mode = #tpu.pipeline_mode<synchronous>, transform_indices = @transform_12, window_bounds = array<i64: 1, 1>}, {pipeline_mode = #tpu.pipeline_mode<synchronous>, transform_indices = @transform_13, window_bounds = array<i64: 16, 32>}]} {
    %c0 = arith.constant 0 : index
    %c0_0 = arith.constant 0 : index
    %0 = vector.load %arg13[%c0, %c0_0] : memref<1x1xf32, #tpu.memory_space<vmem>>, vector<1x1xf32>
    %c0_1 = arith.constant 0 : index
    %c0_2 = arith.constant 0 : index
    %1 = vector.load %arg1[%c0_1, %c0_2] : memref<16x4xf32, #tpu.memory_space<vmem>>, vector<16x4xf32>
    %c0_3 = arith.constant 0 : index
    %c0_4 = arith.constant 0 : index
    %2 = vector.load %arg2[%c0_3, %c0_4] : memref<32x4xf32, #tpu.memory_space<vmem>>, vector<32x4xf32>
    %c0_5 = arith.constant 0 : index
    %c0_6 = arith.constant 0 : index
    %3 = vector.load %arg3[%c0_5, %c0_6] : memref<8x4xf32, #tpu.memory_space<vmem>>, vector<8x4xf32>
    %c0_7 = arith.constant 0 : index
    %c0_8 = arith.constant 0 : index
    %c0_9 = arith.constant 0 : index
    %4 = vector.load %arg4[%c0_7, %c0_8, %c0_9] : memref<7x4x32xf32, #tpu.memory_space<vmem>>, vector<1x4x32xf32>
    %5 = vector.shape_cast %4 : vector<1x4x32xf32> to vector<4x32xf32>
    %cst = arith.constant dense<0.000000e+00> : vector<16x32xf32>
    %6 = tpu.matmul %1, %5, %cst {dimension_numbers = #tpu.dot_dimension_numbers<[1], [0], [0], [1], [0, 0, 1, 1], [], []>} : vector<16x4xf32>, vector<4x32xf32>, vector<16x32xf32> -> vector<16x32xf32>
    %c0_10 = arith.constant 0 : index
    %c0_11 = arith.constant 0 : index
    %c0_12 = arith.constant 0 : index
    %7 = vector.load %arg5[%c0_10, %c0_11, %c0_12] : memref<7x1x32xf32, #tpu.memory_space<vmem>>, vector<1x1x32xf32>
    %8 = vector.shape_cast %7 : vector<1x1x32xf32> to vector<1x32xf32>
    %9 = vector.broadcast %8 : vector<1x32xf32> to vector<16x32xf32>
    %10 = arith.addf %6, %9 : vector<16x32xf32>
    %c1 = arith.constant 1 : index
    %c0_13 = arith.constant 0 : index
    %c0_14 = arith.constant 0 : index
    %11 = vector.load %arg4[%c1, %c0_13, %c0_14] : memref<7x4x32xf32, #tpu.memory_space<vmem>>, vector<1x4x32xf32>
    %12 = vector.shape_cast %11 : vector<1x4x32xf32> to vector<4x32xf32>
    %cst_15 = arith.constant dense<0.000000e+00> : vector<16x32xf32>
    %13 = tpu.matmul %1, %12, %cst_15 {dimension_numbers = #tpu.dot_dimension_numbers<[1], [0], [0], [1], [0, 0, 1, 1], [], []>} : vector<16x4xf32>, vector<4x32xf32>, vector<16x32xf32> -> vector<16x32xf32>
    %c1_16 = arith.constant 1 : index
    %c0_17 = arith.constant 0 : index
    %c0_18 = arith.constant 0 : index
    %14 = vector.load %arg5[%c1_16, %c0_17, %c0_18] : memref<7x1x32xf32, #tpu.memory_space<vmem>>, vector<1x1x32xf32>
    %15 = vector.shape_cast %14 : vector<1x1x32xf32> to vector<1x32xf32>
    %16 = vector.broadcast %15 : vector<1x32xf32> to vector<16x32xf32>
    %17 = arith.addf %13, %16 : vector<16x32xf32>
    %c2 = arith.constant 2 : index
    %c0_19 = arith.constant 0 : index
    %c0_20 = arith.constant 0 : index
    %18 = vector.load %arg4[%c2, %c0_19, %c0_20] : memref<7x4x32xf32, #tpu.memory_space<vmem>>, vector<1x4x32xf32>
    %19 = vector.shape_cast %18 : vector<1x4x32xf32> to vector<4x32xf32>
    %cst_21 = arith.constant dense<0.000000e+00> : vector<32x32xf32>
    %20 = tpu.matmul %2, %19, %cst_21 {dimension_numbers = #tpu.dot_dimension_numbers<[1], [0], [0], [1], [0, 0, 1, 1], [], []>} : vector<32x4xf32>, vector<4x32xf32>, vector<32x32xf32> -> vector<32x32xf32>
    %c2_22 = arith.constant 2 : index
    %c0_23 = arith.constant 0 : index
    %c0_24 = arith.constant 0 : index
    %21 = vector.load %arg5[%c2_22, %c0_23, %c0_24] : memref<7x1x32xf32, #tpu.memory_space<vmem>>, vector<1x1x32xf32>
    %22 = vector.shape_cast %21 : vector<1x1x32xf32> to vector<1x32xf32>
    %23 = vector.broadcast %22 : vector<1x32xf32> to vector<32x32xf32>
    %24 = arith.addf %20, %23 : vector<32x32xf32>
    %c3 = arith.constant 3 : index
    %c0_25 = arith.constant 0 : index
    %c0_26 = arith.constant 0 : index
    %25 = vector.load %arg4[%c3, %c0_25, %c0_26] : memref<7x4x32xf32, #tpu.memory_space<vmem>>, vector<1x4x32xf32>
    %26 = vector.shape_cast %25 : vector<1x4x32xf32> to vector<4x32xf32>
    %cst_27 = arith.constant dense<0.000000e+00> : vector<32x32xf32>
    %27 = tpu.matmul %2, %26, %cst_27 {dimension_numbers = #tpu.dot_dimension_numbers<[1], [0], [0], [1], [0, 0, 1, 1], [], []>} : vector<32x4xf32>, vector<4x32xf32>, vector<32x32xf32> -> vector<32x32xf32>
    %c3_28 = arith.constant 3 : index
    %c0_29 = arith.constant 0 : index
    %c0_30 = arith.constant 0 : index
    %28 = vector.load %arg5[%c3_28, %c0_29, %c0_30] : memref<7x1x32xf32, #tpu.memory_space<vmem>>, vector<1x1x32xf32>
    %29 = vector.shape_cast %28 : vector<1x1x32xf32> to vector<1x32xf32>
    %30 = vector.broadcast %29 : vector<1x32xf32> to vector<32x32xf32>
    %31 = arith.addf %27, %30 : vector<32x32xf32>
    %c4 = arith.constant 4 : index
    %c0_31 = arith.constant 0 : index
    %c0_32 = arith.constant 0 : index
    %32 = vector.load %arg4[%c4, %c0_31, %c0_32] : memref<7x4x32xf32, #tpu.memory_space<vmem>>, vector<1x4x32xf32>
    %33 = vector.shape_cast %32 : vector<1x4x32xf32> to vector<4x32xf32>
    %cst_33 = arith.constant dense<0.000000e+00> : vector<32x32xf32>
    %34 = tpu.matmul %2, %33, %cst_33 {dimension_numbers = #tpu.dot_dimension_numbers<[1], [0], [0], [1], [0, 0, 1, 1], [], []>} : vector<32x4xf32>, vector<4x32xf32>, vector<32x32xf32> -> vector<32x32xf32>
    %c4_34 = arith.constant 4 : index
    %c0_35 = arith.constant 0 : index
    %c0_36 = arith.constant 0 : index
    %35 = vector.load %arg5[%c4_34, %c0_35, %c0_36] : memref<7x1x32xf32, #tpu.memory_space<vmem>>, vector<1x1x32xf32>
    %36 = vector.shape_cast %35 : vector<1x1x32xf32> to vector<1x32xf32>
    %37 = vector.broadcast %36 : vector<1x32xf32> to vector<32x32xf32>
    %38 = arith.addf %34, %37 : vector<32x32xf32>
    %c5 = arith.constant 5 : index
    %c0_37 = arith.constant 0 : index
    %c0_38 = arith.constant 0 : index
    %39 = vector.load %arg4[%c5, %c0_37, %c0_38] : memref<7x4x32xf32, #tpu.memory_space<vmem>>, vector<1x4x32xf32>
    %40 = vector.shape_cast %39 : vector<1x4x32xf32> to vector<4x32xf32>
    %cst_39 = arith.constant dense<0.000000e+00> : vector<8x32xf32>
    %41 = tpu.matmul %3, %40, %cst_39 {dimension_numbers = #tpu.dot_dimension_numbers<[1], [0], [0], [1], [0, 0, 1, 1], [], []>} : vector<8x4xf32>, vector<4x32xf32>, vector<8x32xf32> -> vector<8x32xf32>
    %c5_40 = arith.constant 5 : index
    %c0_41 = arith.constant 0 : index
    %c0_42 = arith.constant 0 : index
    %42 = vector.load %arg5[%c5_40, %c0_41, %c0_42] : memref<7x1x32xf32, #tpu.memory_space<vmem>>, vector<1x1x32xf32>
    %43 = vector.shape_cast %42 : vector<1x1x32xf32> to vector<1x32xf32>
    %44 = vector.broadcast %43 : vector<1x32xf32> to vector<8x32xf32>
    %45 = arith.addf %41, %44 : vector<8x32xf32>
    %c6 = arith.constant 6 : index
    %c0_43 = arith.constant 0 : index
    %c0_44 = arith.constant 0 : index
    %46 = vector.load %arg4[%c6, %c0_43, %c0_44] : memref<7x4x32xf32, #tpu.memory_space<vmem>>, vector<1x4x32xf32>
    %47 = vector.shape_cast %46 : vector<1x4x32xf32> to vector<4x32xf32>
    %cst_45 = arith.constant dense<0.000000e+00> : vector<8x32xf32>
    %48 = tpu.matmul %3, %47, %cst_45 {dimension_numbers = #tpu.dot_dimension_numbers<[1], [0], [0], [1], [0, 0, 1, 1], [], []>} : vector<8x4xf32>, vector<4x32xf32>, vector<8x32xf32> -> vector<8x32xf32>
    %c6_46 = arith.constant 6 : index
    %c0_47 = arith.constant 0 : index
    %c0_48 = arith.constant 0 : index
    %49 = vector.load %arg5[%c6_46, %c0_47, %c0_48] : memref<7x1x32xf32, #tpu.memory_space<vmem>>, vector<1x1x32xf32>
    %50 = vector.shape_cast %49 : vector<1x1x32xf32> to vector<1x32xf32>
    %51 = vector.broadcast %50 : vector<1x32xf32> to vector<8x32xf32>
    %52 = arith.addf %48, %51 : vector<8x32xf32>
    %53 = tpu.concatenate %10, %31 in 0 : vector<16x32xf32>, vector<32x32xf32> -> vector<48x32xf32>
    %c0_49 = arith.constant 0 : index
    %c0_50 = arith.constant 0 : index
    %54 = vector.load %arg6[%c0_49, %c0_50] : memref<16x48xf32, #tpu.memory_space<vmem>>, vector<16x48xf32>
    %cst_51 = arith.constant dense<0.000000e+00> : vector<16x32xf32>
    %55 = tpu.matmul %54, %53, %cst_51 {dimension_numbers = #tpu.dot_dimension_numbers<[1], [0], [0], [1], [0, 0, 1, 1], [], []>} : vector<16x48xf32>, vector<48x32xf32>, vector<16x32xf32> -> vector<16x32xf32>
    %cst_52 = arith.constant 0.000000e+00 : f32
    %56 = vector.broadcast %cst_52 : f32 to vector<16x32xf32>
    %57 = arith.cmpf oge, %55, %56 : vector<16x32xf32>
    %58 = vector.broadcast %0 : vector<1x1xf32> to vector<16x32xf32>
    %59 = arith.mulf %58, %55 : vector<16x32xf32>
    %60 = arith.select %57, %55, %59 : vector<16x32xi1>, vector<16x32xf32>
    %cst_53 = arith.constant 5.000000e-01 : f32
    %61 = vector.broadcast %cst_53 : f32 to vector<16x32xf32>
    %62 = arith.mulf %61, %60 : vector<16x32xf32>
    %63 = tpu.concatenate %24, %17, %52 in 0 : vector<32x32xf32>, vector<16x32xf32>, vector<8x32xf32> -> vector<56x32xf32>
    %c0_54 = arith.constant 0 : index
    %c0_55 = arith.constant 0 : index
    %64 = vector.load %arg7[%c0_54, %c0_55] : memref<32x56xf32, #tpu.memory_space<vmem>>, vector<32x56xf32>
    %cst_56 = arith.constant dense<0.000000e+00> : vector<32x32xf32>
    %65 = tpu.matmul %64, %63, %cst_56 {dimension_numbers = #tpu.dot_dimension_numbers<[1], [0], [0], [1], [0, 0, 1, 1], [], []>} : vector<32x56xf32>, vector<56x32xf32>, vector<32x32xf32> -> vector<32x32xf32>
    %cst_57 = arith.constant 0.000000e+00 : f32
    %66 = vector.broadcast %cst_57 : f32 to vector<32x32xf32>
    %67 = arith.cmpf oge, %65, %66 : vector<32x32xf32>
    %68 = vector.broadcast %0 : vector<1x1xf32> to vector<32x32xf32>
    %69 = arith.mulf %68, %65 : vector<32x32xf32>
    %70 = arith.select %67, %65, %69 : vector<32x32xi1>, vector<32x32xf32>
    %cst_58 = arith.constant 0.333333343 : f32
    %71 = vector.broadcast %cst_58 : f32 to vector<32x32xf32>
    %72 = arith.mulf %71, %70 : vector<32x32xf32>
    %73 = tpu.concatenate %45, %38 in 0 : vector<8x32xf32>, vector<32x32xf32> -> vector<40x32xf32>
    %c0_59 = arith.constant 0 : index
    %c0_60 = arith.constant 0 : index
    %74 = vector.load %arg8[%c0_59, %c0_60] : memref<8x40xf32, #tpu.memory_space<vmem>>, vector<8x40xf32>
    %cst_61 = arith.constant dense<0.000000e+00> : vector<8x32xf32>
    %75 = tpu.matmul %74, %73, %cst_61 {dimension_numbers = #tpu.dot_dimension_numbers<[1], [0], [0], [1], [0, 0, 1, 1], [], []>} : vector<8x40xf32>, vector<40x32xf32>, vector<8x32xf32> -> vector<8x32xf32>
    %cst_62 = arith.constant 0.000000e+00 : f32
    %76 = vector.broadcast %cst_62 : f32 to vector<8x32xf32>
    %77 = arith.cmpf oge, %75, %76 : vector<8x32xf32>
    %78 = vector.broadcast %0 : vector<1x1xf32> to vector<8x32xf32>
    %79 = arith.mulf %78, %75 : vector<8x32xf32>
    %80 = arith.select %77, %75, %79 : vector<8x32xi1>, vector<8x32xf32>
    %cst_63 = arith.constant 5.000000e-01 : f32
    %81 = vector.broadcast %cst_63 : f32 to vector<8x32xf32>
    %82 = arith.mulf %81, %80 : vector<8x32xf32>
    %c0_64 = arith.constant 0 : index
    %c0_65 = arith.constant 0 : index
    %83 = vector.load %arg10[%c0_64, %c0_65] : memref<32x8xf32, #tpu.memory_space<vmem>>, vector<32x8xf32>
    %cst_66 = arith.constant dense<0.000000e+00> : vector<32x32xf32>
    %84 = tpu.matmul %83, %82, %cst_66 {dimension_numbers = #tpu.dot_dimension_numbers<[1], [0], [0], [1], [0, 0, 1, 1], [], []>} : vector<32x8xf32>, vector<8x32xf32>, vector<32x32xf32> -> vector<32x32xf32>
    %c0_67 = arith.constant 0 : index
    %c0_68 = arith.constant 0 : index
    %85 = vector.load %arg11[%c0_67, %c0_68] : memref<32x32xf32, #tpu.memory_space<vmem>>, vector<32x32xf32>
    %cst_69 = arith.constant dense<0.000000e+00> : vector<32x32xf32>
    %86 = tpu.matmul %84, %85, %cst_69 {dimension_numbers = #tpu.dot_dimension_numbers<[1], [0], [0], [1], [0, 0, 1, 1], [], []>} : vector<32x32xf32>, vector<32x32xf32>, vector<32x32xf32> -> vector<32x32xf32>
    %c0_70 = arith.constant 0 : index
    %c0_71 = arith.constant 0 : index
    %87 = vector.load %arg12[%c0_70, %c0_71] : memref<1x32xf32, #tpu.memory_space<vmem>>, vector<1x32xf32>
    %88 = vector.broadcast %87 : vector<1x32xf32> to vector<32x32xf32>
    %89 = arith.addf %86, %88 : vector<32x32xf32>
    %c0_72 = arith.constant 0 : index
    %c0_73 = arith.constant 0 : index
    %90 = vector.load %arg9[%c0_72, %c0_73] : memref<16x32xf32, #tpu.memory_space<vmem>>, vector<16x32xf32>
    %91 = arith.addf %72, %89 : vector<32x32xf32>
    %cst_74 = arith.constant dense<0.000000e+00> : vector<16x32xf32>
    %92 = tpu.matmul %90, %91, %cst_74 {dimension_numbers = #tpu.dot_dimension_numbers<[1], [0], [0], [1], [0, 0, 1, 1], [], []>} : vector<16x32xf32>, vector<32x32xf32>, vector<16x32xf32> -> vector<16x32xf32>
    %93 = arith.addf %62, %92 : vector<16x32xf32>
    %cst_75 = arith.constant 0.333333343 : f32
    %94 = vector.broadcast %cst_75 : f32 to vector<16x32xf32>
    %95 = arith.mulf %93, %94 : vector<16x32xf32>
    %c0_76 = arith.constant 0 : index
    %c0_77 = arith.constant 0 : index
    %96 = vector.load %arg14[%c0_76, %c0_77] : memref<16x32xf32, #tpu.memory_space<vmem>>, vector<16x32xf32>
    tpu.vector_store %arg14[%c0_76, %c0_77], %95 {strides = array<i32>} : memref<16x32xf32, #tpu.memory_space<vmem>>, vector<16x32xf32>,
    return
  }
  func.func @transform_0(%arg0: i32) -> (i32, i32) {
    %c0_i32 = arith.constant 0 : i32
    %c0_i32_0 = arith.constant 0 : i32
    %c0_i32_1 = arith.constant 0 : i32
    return %c0_i32, %c0_i32_0 : i32, i32
  }
  func.func @transform_1(%arg0: i32) -> (i32, i32) {
    %c0_i32 = arith.constant 0 : i32
    %c0_i32_0 = arith.constant 0 : i32
    %c0_i32_1 = arith.constant 0 : i32
    return %c0_i32, %c0_i32_0 : i32, i32
  }
  func.func @transform_2(%arg0: i32) -> (i32, i32) {
    %c0_i32 = arith.constant 0 : i32
    %c0_i32_0 = arith.constant 0 : i32
    %c0_i32_1 = arith.constant 0 : i32
    return %c0_i32, %c0_i32_0 : i32, i32
  }
  func.func @transform_3(%arg0: i32) -> (i32, i32, i32) {
    %c0_i32 = arith.constant 0 : i32
    %c0_i32_0 = arith.constant 0 : i32
    %c0_i32_1 = arith.constant 0 : i32
    %c0_i32_2 = arith.constant 0 : i32
    return %c0_i32, %c0_i32_0, %c0_i32_1 : i32, i32, i32
  }
  func.func @transform_4(%arg0: i32) -> (i32, i32, i32) {
    %c0_i32 = arith.constant 0 : i32
    %c0_i32_0 = arith.constant 0 : i32
    %c0_i32_1 = arith.constant 0 : i32
    %c0_i32_2 = arith.constant 0 : i32
    return %c0_i32, %c0_i32_0, %c0_i32_1 : i32, i32, i32
  }
  func.func @transform_5(%arg0: i32) -> (i32, i32) {
    %c0_i32 = arith.constant 0 : i32
    %c0_i32_0 = arith.constant 0 : i32
    %c0_i32_1 = arith.constant 0 : i32
    return %c0_i32, %c0_i32_0 : i32, i32
  }
  func.func @transform_6(%arg0: i32) -> (i32, i32) {
    %c0_i32 = arith.constant 0 : i32
    %c0_i32_0 = arith.constant 0 : i32
    %c0_i32_1 = arith.constant 0 : i32
    return %c0_i32, %c0_i32_0 : i32, i32
  }
  func.func @transform_7(%arg0: i32) -> (i32, i32) {
    %c0_i32 = arith.constant 0 : i32
    %c0_i32_0 = arith.constant 0 : i32
    %c0_i32_1 = arith.constant 0 : i32
    return %c0_i32, %c0_i32_0 : i32, i32
  }
  func.func @transform_8(%arg0: i32) -> (i32, i32) {
    %c0_i32 = arith.constant 0 : i32
    %c0_i32_0 = arith.constant 0 : i32
    %c0_i32_1 = arith.constant 0 : i32
    return %c0_i32, %c0_i32_0 : i32, i32
  }
  func.func @transform_9(%arg0: i32) -> (i32, i32) {
    %c0_i32 = arith.constant 0 : i32
    %c0_i32_0 = arith.constant 0 : i32
    %c0_i32_1 = arith.constant 0 : i32
    return %c0_i32, %c0_i32_0 : i32, i32
  }
  func.func @transform_10(%arg0: i32) -> (i32, i32) {
    %c0_i32 = arith.constant 0 : i32
    %c0_i32_0 = arith.constant 0 : i32
    %c0_i32_1 = arith.constant 0 : i32
    return %c0_i32, %c0_i32_0 : i32, i32
  }
  func.func @transform_11(%arg0: i32) -> (i32, i32) {
    %c0_i32 = arith.constant 0 : i32
    %c0_i32_0 = arith.constant 0 : i32
    %c0_i32_1 = arith.constant 0 : i32
    return %c0_i32, %c0_i32_0 : i32, i32
  }
  func.func @transform_12(%arg0: i32) -> (i32, i32) {
    %c0_i32 = arith.constant 0 : i32
    %c0_i32_0 = arith.constant 0 : i32
    %c0_i32_1 = arith.constant 0 : i32
    return %c0_i32, %c0_i32_0 : i32, i32
  }
  func.func @transform_13(%arg0: i32) -> (i32, i32) {
    %c0_i32 = arith.constant 0 : i32
    %c0_i32_0 = arith.constant 0 : i32
    %c0_i32_1 = arith.constant 0 : i32
    return %c0_i32, %c0_i32_0 : i32, i32
  }
}

</mosaic_0001>

<bundles_post_ra>
// kernel: planetoid_scconv_forward.1
= control target key start
LH: loop header
LB: loop body
LE: loop exit
PB: predicated region body
PF: predicated region fallthrough
CT: control target
= control target key end

     0   :  { %s1882_s0 = inlined_call_operand.vmem [shape: f32[16,4], index: 0, kind: input, shape index: {}]   ;;  %s1883_s1 = inlined_call_operand.vmem [shape: f32[32,4], index: 1, kind: input, shape index: {}]   ;;  %s1884_s2 = inlined_call_operand.vmem [shape: f32[8,4], index: 2, kind: input, shape index: {}]   ;;  %s1885_s3 = inlined_call_operand.vmem [shape: f32[7,4,32], index: 3, kind: input, shape index: {}]   ;;  %s1886_s4 = inlined_call_operand.vmem [shape: f32[7,1,32], index: 4, kind: input, shape index: {}]   ;;  %s1887_s5 = inlined_call_operand.vmem [shape: f32[16,48], index: 5, kind: input, shape index: {}]   ;;  %s1888_s6 = inlined_call_operand.vmem [shape: f32[32,56], index: 6, kind: input, shape index: {}]   ;;  %s1889_s7 = inlined_call_operand.vmem [shape: f32[8,40], index: 7, kind: input, shape index: {}]   ;;  %s1890_s8 = inlined_call_operand.vmem [shape: f32[16,32], index: 8, kind: input, shape index: {}]   ;;  %s1891_s9 = inlined_call_operand.vmem [shape: f32[32,8], index: 9, kind: input, shape index: {}]   ;;  %s1892_s10 = inlined_call_operand.vmem [shape: f32[32,32], index: 10, kind: input, shape index: {}]   ;;  %s1893_s11 = inlined_call_operand.vmem [shape: f32[1,32], index: 11, kind: input, shape index: {}]   ;;  %s1894_s12 = inlined_call_operand.<no memory space> [shape: f32[1,1], index: 12, kind: input, shape index: {}]   ;;  %s1895_s13 = inlined_call_operand.hbm [shape: f32[16,32], index: 13, kind: output, shape index: {}]  }
   0x1   :  { %v18_v0 = vstv %s1894_s12 }
   0x2   :  { %19 = vst [vmem:[#allocation2] sm:$0x1] %v18_v0 }
   0x3   :  { %vm70_vm0 = vcmask 1043456   ;;  %v1334_v1 = vld [vmem:[%s1885_s3 + $0x4] sm:$0xf]  ;;  %vm63_vm1 = vcmask 31744   ;;  %v49_v3 = vld [vmem:[%s1882_s0 + $0x8] sm:$0xff] }
   0x4   :  { %v48_v2 = vld [vmem:[%s1882_s0] sm:$0xff]  ;;  %1467 = vmatprep.subr.msk.mxu1 %vm70_vm0, %v1334_v1  ;;  %v1348_v5 = vld [vmem:[%s1885_s3 + $0xc] sm:$0xf]  ;;  %v1340_v7 = vld [vmem:[%s1885_s3 + $0x8] sm:$0xf] }
   0x5   :  { %1469 = vmatprep.mubr.msk.f32.mxu1 %vm63_vm1, %v48_v2  ;;  %v55_v4 = vld [vmem:[%s1885_s3] sm:$0xf]  ;;  %1468 = vmatpush3.msk.msra.mxu1 %vm70_vm0, %v1334_v1  ;;  %v51_v8 = vld [vmem:[%s1883_s1 + $0x8] sm:$0xff] }
   0x6   :  { %1462 = vmatprep.subr.msk.mxu0 %vm70_vm0, %v55_v4  ;;  %1470 = vmatmul.mubr.msk.f32.vlgmr.msra.gmra.mxu1 %vm63_vm1, %v49_v3  ;;  %v50_v6 = vld [vmem:[%s1883_s1] sm:$0xff] }
   0x7   :  { %1463 = vmatpush3.msk.msra.mxu0 %vm70_vm0, %v55_v4  ;;  %1464 = vmatprep.mubr.msk.f32.mxu0 %vm63_vm1, %v48_v2 }
   0x8   :  { %1480 = vmatprep.subr.msk.mxu1 %vm70_vm0, %v1348_v5 }
   0x9   :  { %20 = vsyncpa [#allocation4], 0  ;;  %1465 = vmatmul.mubr.msk.f32.vlgmr.msra.gmra.mxu0 %vm63_vm1, %v49_v3  ;;  %1481 = vmatpush3.msk.msra.mxu1 %vm70_vm0, %v1348_v5  ;;  %v52_v9 = vld [vmem:[%s1883_s1 + $0x10] sm:$0xff]  ;;  %v53_v11 = vld [vmem:[%s1883_s1 + $0x18] sm:$0xff]  ;;  %v1616_v12 = vmov 0.0   ;;  %vm1617_vm2 = vmmov 0  }
   0xa   :  { %1482 = vmatprep.mubr.msk.f32.mxu1 %vm63_vm1, %v50_v6  ;;  %1472 = vmatprep.subr.msk.mxu0 %vm70_vm0, %v1340_v7  ;;  %v1356_v10 = vld [vmem:[%s1885_s3 + $0x10] sm:$0xf]  ;;  %v1364_v13 = vld [vmem:[%s1885_s3 + $0x14] sm:$0xf]  ;;  %v54_v14 = vld [vmem:[%s1884_s2] sm:$0xff]  ;;  %vm714_vm3 = vcmask 392192  }
   0xb   :  { %1483 = vmatmul.mubr.msk.f32.vlgmr.msra.gmra.mxu1 %vm63_vm1, %v51_v8  ;;  %1473 = vmatpush3.msk.msra.mxu0 %vm70_vm0, %v1340_v7  ;;  %v1369_v15 = vld [vmem:[%s1885_s3 + $0x18] sm:$0xf]  ;;  %v712_v16 = vld [vmem:[%s1887_s5] sm:$0xff]  ;;  %vm817_vm4 = vcmask 457728   ;;  %v1618_v19 = vmov 0   ;;  %v713_v52 = vld [vmem:[%s1887_s5 + $0x8] sm:$0xff] }
   0xc   :  { %1474 = vmatprep.mubr.msk.f32.mxu0 %vm63_vm1, %v50_v6  ;;  %1485 = vmatprep.mubr.msk.f32.mxu1 %vm63_vm1, %v52_v9  ;;  %v813_v17 = vld [vmem:[%s1888_s6] sm:$0xff]  ;;  %v814_v2 = vld [vmem:[%s1888_s6 + $0x8] sm:$0xff]  ;;  %vm932_vm5 = vcmask 326656   ;;  %v815_v4 = vld [vmem:[%s1888_s6 + $0x10] sm:$0xff]  ;;  %vm1014_vm6 = vcmask 64512   ;;  %vm1123_vm10 = vcmask 261120  }
   0xd   :  { %1475 = vmatmul.mubr.msk.f32.vlgmr.msra.gmra.mxu0 %vm63_vm1, %v51_v8  ;;  %1496 = vmatprep.subr.mxu1 %v1616_v12  ;;  %v1376_v18 = vld [vmem:[#allocation2] ss:$0 sm:$0xff]  ;;  %v1350_v27 = vld [vmem:[%s1886_s4 + $0x3] ss:$0 sm:$0xff]  ;;  %v1371_v40 = vld [vmem:[%s1886_s4 + $0x6] ss:$0 sm:$0xff] }
   0xe   :  { %1477 = vmatprep.mubr.msk.f32.mxu0 %vm63_vm1, %v52_v9  ;;  %1488 = vmatprep.subr.msk.mxu0 %vm70_vm0, %v1356_v10  ;;  %v1330_v37 = vld [vmem:[%s1886_s4] ss:$0 sm:$0xff]  ;;  %v1336_v42 = vld [vmem:[%s1886_s4 + $0x1] ss:$0 sm:$0xff]  ;;  %v1358_v51 = vld [vmem:[%s1886_s4 + $0x4] ss:$0 sm:$0xff] }
   0xf   :  { %1486 = vmatmul.mubr.msk.f32.gmra.mxu1 %vm63_vm1, %v53_v11  ;;  %1489 = vmatpush3.msk.msra.mxu0 %vm70_vm0, %v1356_v10  ;;  %v1342_v55 = vld [vmem:[%s1886_s4 + $0x2] ss:$0 sm:$0xff]  ;;  %v1366_v60 = vld [vmem:[%s1886_s4 + $0x5] ss:$0 sm:$0xff]  ;;  %v816_v5 = vld [vmem:[%s1888_s6 + $0x18] sm:$0xff]  ;;  %s1619_s15 = smov [#allocation3]  }
  0x10   :  { %1497 = vmatpush3.msk.msra.mxu1 %vm70_vm0, %v1364_v13  ;;  %1498 = vmatprep.mubr.msk.f32.mxu1 %vm1617_vm2, %v1616_v12  ;;  %v931_v3 = vld [vmem:[%s1889_s7] sm:$0xff]  ;;  %v1115_v7 = vld [vmem:[%s1892_s10 + $0x18] sm:$0xff]  ;;  %s1319_s12 = sshll.u32 %s1619_s15, 4  ;;  %s1320_s12 = int_to_ptr.vmem [resolvable:$true] %s1319_s12 }
  0x11   :  { %1478 = vmatmul.mubr.msk.f32.gmra.mxu0 %vm63_vm1, %v53_v11  ;;  %1501 = vmatprep.subr.mxu1 %v1616_v12  ;;  %p1599_p1 = scmp.lt.s32.totalorder %s1320_s12, %s1320_s12 }
  0x12   :  { %1490 = vmatprep.mubr.msk.f32.mxu0 %vm63_vm1, %v50_v6  ;;  %1593 = vset.pattern.permute.xlu0 %v1618_v19  ;;  %v1010_v6 = vld [vmem:[%s1891_s9] sm:$0xff] }
  0x13   :  { %1499 = vmatmul.mubr.msk.f32.vlgmr.msra.gmra.mxu1 %vm63_vm1, %v54_v14  ;;  %804 = vperm.xlu0 %1593, %v1376_v18  }
  0x14   :  { %1502 = vmatpush3.msk.msra.mxu1 %vm70_vm0, %v1369_v15  ;;  %1503 = vmatprep.mubr.msk.f32.mxu1 %vm1617_vm2, %v1616_v12 }
  0x15   :  { %1491 = vmatmul.mubr.msk.f32.vlgmr.msra.gmra.mxu0 %vm63_vm1, %v51_v8  ;;  %v1114_v8 = vld [vmem:[%s1892_s10 + $0x10] sm:$0xff] }
  0x16   :  { %1493 = vmatprep.mubr.msk.f32.mxu0 %vm63_vm1, %v52_v9 }
  0x17   :  { %1504 = vmatmul.mubr.msk.f32.vlgmr.msra.gmra.mxu1 %vm63_vm1, %v54_v14 }
  0x18   :  { %1535 = vmatprep.mubr.msk.f32.mxu1 %vm817_vm4, %v813_v17 }
  0x19   :  { %1494 = vmatmul.mubr.msk.f32.gmra.mxu0 %vm63_vm1, %v53_v11 }
  0x1a   :  { %1518 = vmatprep.mubr.msk.f32.mxu0 %vm714_vm3, %v712_v16 }
  0x8e   :  { %v805_v9 = vpop.permute.xlu0 %804 }
  0xc6   :  { %v1471_v20 = vpop.f32.mrf.mxu1 }
  0xc7   :  { %v234_v49 = vadd.f32 %v1471_v20, %v1336_v42 }
  0xc8   :  { %v228_v21 = vpop.f32.mrf.mxu1 }
  0xc9   :  { %v1466_v22 = vpop.f32.mrf.mxu0  ;;  %v229_v53 = vadd.f32 %v1336_v42, %v228_v21  ;;  %v1011_v21 = vld [vmem:[%s1891_s9 + $0x8] sm:$0xff] }
  0xca   :  { %v146_v45 = vadd.f32 %v1466_v22, %v1330_v37  ;;  %v1012_v22 = vld [vmem:[%s1891_s9 + $0x10] sm:$0xff] }
  0xcb   :  { %v1484_v23 = vpop.f32.mrf.mxu1  ;;  %v140_v24 = vpop.f32.mrf.mxu0 }
  0xcc   :  { %v432_v36 = vadd.f32 %v1484_v23, %v1350_v27  ;;  %v141_v50 = vadd.f32 %v1330_v37, %v140_v24  ;;  %v1013_v23 = vld [vmem:[%s1891_s9 + $0x18] sm:$0xff]  ;;  %v1113_v24 = vld [vmem:[%s1892_s10 + $0x8] sm:$0xff] }
  0xcd   :  { %v426_v25 = vpop.f32.mrf.mxu1  ;;  %v1476_v26 = vpop.f32.mrf.mxu0 }
  0xce   :  { %v427_v41 = vadd.f32 %v1350_v27, %v426_v25  ;;  %v334_v61 = vadd.f32 %v1476_v26, %v1342_v55  ;;  %v1112_v25 = vld [vmem:[%s1892_s10] sm:$0xff] }
  0xcf   :  { %v1487_v28 = vpop.f32.mrf.mxu1  ;;  %v328_v29 = vpop.f32.mrf.mxu0 }
  0xd0   :  { %v442_v30 = vadd.f32 %v1487_v28, %v1350_v27  ;;  %v329_v63 = vadd.f32 %v1342_v55, %v328_v29 }
  0xd1   :  { %v436_v31 = vpop.f32.mrf.mxu1  ;;  %v1479_v32 = vpop.f32.mrf.mxu0 }
  0xd2   :  { %v437_v33 = vadd.f32 %v1350_v27, %v436_v31  ;;  %1506 = vmatprep.subr.mxu0 %v442_v30  ;;  %v344_v57 = vadd.f32 %v1479_v32, %v1342_v55 }
  0xd3   :  { %v625_v34 = vpop.f32.mrf.mxu1  ;;  %1507 = vmatpush3.msra.mxu0 %v442_v30  ;;  %v338_v35 = vpop.f32.mrf.mxu0  ;;  %v1221_v30 = vld [vmem:[%s1890_s8] sm:$0xff] }
  0xd4   :  { %1508 = vmatprep.subr.mxu0 %v437_v33  ;;  %v339_v58 = vadd.f32 %v1342_v55, %v338_v35  ;;  %v626_v0 = vadd.f32 %v1366_v60, %v625_v34  ;;  %v1222_v60 = vld [vmem:[%s1890_s8 + $0x8] sm:$0xff]  ;;  %s1594_s8 = scalar_lea.vmem %s1320_s12, 256 }
  0xd5   :  { %v1500_v38 = vpop.f32.mrf.mxu1  ;;  %1509 = vmatpush3.msra.mxu0 %v437_v33  ;;  %v1492_v39 = vpop.f32.mrf.mxu0  ;;  %p1595_p0 = scmp.ne.s32.totalorder %s1320_s12, %s1594_s8  ;;  %p1600_p2 = scmp.lt.s32.totalorder %s1594_s8, %s1594_s8 }
  0xd6   :  { %1510 = vmatprep.subr.mxu0 %v432_v36  ;;  %v530_v62 = vadd.f32 %v1492_v39, %v1358_v51 }
  0xd7   :  { %v708_v43 = vpop.f32.mrf.mxu1  ;;  %1511 = vmatpush3.msra.mxu0 %v432_v36  ;;  %v524_v44 = vpop.f32.mrf.mxu0  ;;  %p1601_p3 = por %p1600_p2, %p1599_p1 }
  0xd8   :  { %v709_v46 = vadd.f32 %v1371_v40, %v708_v43  ;;  %1512 = vmatprep.subr.mxu0 %v427_v41  ;;  %v525_v1 = vadd.f32 %v1358_v51, %v524_v44  ;;  %v1386_v43 = vld [vmem:[%s1893_s11] ss:$0 sm:$0xff] }
  0xd9   :  { %1513 = vmatpush3.msra.mxu0 %v427_v41  ;;  %v1495_v47 = vpop.f32.mrf.mxu0  ;;  %v1505_v48 = vpop.f32.mrf.mxu1  ;;  %p1602_p4 = pnand %p1601_p3, %p1595_p0 }
  0xda   :  { %1514 = vmatprep.subr.mxu0 %v146_v45  ;;  %1521 = vmatprep.subr.mxu1 %v709_v46  ;;  %v540_v54 = vadd.f32 %v1495_v47, %v1358_v51 }
  0xdb   :  { %1515 = vmatpush3.msra.mxu0 %v146_v45  ;;  %1522 = vmatpush3.msra.mxu1 %v709_v46  ;;  %v534_v56 = vpop.f32.mrf.mxu0 }
  0xdc   :  { %1516 = vmatprep.subr.mxu0 %v141_v50  ;;  %1523 = vmatprep.subr.mxu1 %v234_v49  ;;  %v535_v59 = vadd.f32 %v1358_v51, %v534_v56 }
  0xdd   :  { %1517 = vmatpush3.msra.mxu0 %v141_v50  ;;  %1524 = vmatpush3.msra.mxu1 %v234_v49 }
  0xde   :  { %1519 = vmatmul.mubr.msk.f32.vlgmr.msra.gmra.mxu0 %vm714_vm3, %v713_v52  ;;  %1525 = vmatprep.subr.mxu1 %v229_v53 }
  0xdf   :  { %1541 = vmatprep.subr.mxu0 %v1616_v12  ;;  %1526 = vmatpush3.msra.mxu1 %v229_v53 }
  0xe0   :  { %1542 = vmatpush3.msra.mxu0 %v540_v54  ;;  %1527 = vmatprep.subr.mxu1 %v344_v57 }
  0xe1   :  { %1543 = vmatprep.subr.mxu0 %v1616_v12  ;;  %1528 = vmatpush3.msra.mxu1 %v344_v57 }
  0xe2   :  { %1544 = vmatpush3.msra.mxu0 %v535_v59  ;;  %1529 = vmatprep.subr.mxu1 %v339_v58 }
  0xe3   :  { %1545 = vmatprep.subr.mxu0 %v1616_v12  ;;  %1530 = vmatpush3.msra.mxu1 %v339_v58 }
  0xe4   :  { %1546 = vmatpush3.msra.mxu0 %v530_v62  ;;  %1531 = vmatprep.subr.mxu1 %v334_v61 }
  0xe5   :  { %1547 = vmatprep.subr.mxu0 %v1616_v12  ;;  %1532 = vmatpush3.msra.mxu1 %v334_v61 }
  0xe6   :  { %1548 = vmatpush3.msra.mxu0 %v525_v1  ;;  %1533 = vmatprep.subr.mxu1 %v329_v63 }
  0xe7   :  { %1549 = vmatprep.subr.mxu0 %v1616_v12  ;;  %1534 = vmatpush3.msra.mxu1 %v329_v63 }
  0xe8   :  { %1550 = vmatpush3.msra.mxu0 %v626_v0  ;;  %1551 = vmatprep.mubr.msk.f32.mxu0 %vm1617_vm2, %v1616_v12 }
  0xe9   :  { %1536 = vmatmul.mubr.msk.f32.vlgmr.msra.gmra.mxu1 %vm817_vm4, %v814_v2  ;;  %1552 = vmatmul.mubr.msk.f32.vlgmr.msra.gmra.mxu0 %vm932_vm5, %v931_v3 }
  0xea   :  { %1538 = vmatprep.mubr.msk.f32.mxu1 %vm817_vm4, %v815_v4  ;;  %1556 = vmatprep.mubr.msk.f32.mxu0 %vm1014_vm6, %v1010_v6 }
  0xeb   :  { %1562 = vmatprep.subr.mxu1 %v1115_v7 }
  0xec   :  { %1563 = vmatpush3.msra.mxu1 %v1115_v7 }
  0xed   :  { %1539 = vmatmul.mubr.msk.f32.gmra.mxu1 %vm817_vm4, %v816_v5  ;;  %1564 = vmatprep.subr.mxu1 %v1114_v8 }
  0xee   :  { %1565 = vmatpush3.msra.mxu1 %v1114_v8 }
  0xef   :  { %1566 = vmatprep.subr.mxu1 %v1113_v24 }
  0xf0   :  { %1567 = vmatpush3.msra.mxu1 %v1113_v24 }
  0xf1   :  { %1568 = vmatprep.subr.mxu1 %v1112_v25 }
  0xf2   :  { %1569 = vmatpush3.msra.mxu1 %v1112_v25 }
 0x19e   :  { %v1520_v10 = vpop.f32.mrf.mxu0 }
 0x19f   :  { %vm797_vm7 = vcmp.ge.f32.partialorder %v1520_v10, 0.0  ;;  %v808_v11 = vmul.f32 %v1520_v10, %v805_v9 }
 0x1a0   :  { %v787_v12 = vpop.f32.mrf.mxu0 }
 0x1a1   :  { %vm796_vm8 = vcmp.ge.f32.partialorder %v787_v12, 0.0  ;;  %v807_v13 = vmul.f32 %v805_v9, %v787_v12  ;;  %v1838_v14 = vsel %vm797_vm7, %v1520_v10, %v808_v11 }
 0x1a2   :  { %v812_v61 = vmul.f32 0.5, %v1838_v14 }
 0x1a3   :  { %v1840_v15 = vsel %vm796_vm8, %v787_v12, %v807_v13 }
 0x1a4   :  { %v811_v0 = vmul.f32 0.5, %v1840_v15 }
 0x1a9   :  { %v1002_v16 = vpop.f32.mrf.mxu0  ;;  %v1537_v31 = vpop.f32.mrf.mxu1 }
 0x1aa   :  { %vm1006_vm9 = vcmp.ge.f32.partialorder %v1002_v16, 0.0  ;;  %v1007_v17 = vmul.f32 %v1002_v16, %v805_v9  ;;  %v920_v38 = vmul.f32 %v1537_v31, %v805_v9  ;;  %vm916_vm13 = vcmp.ge.f32.partialorder %v1537_v31, 0.0 }
 0x1ab   :  { %v1553_v18 = vpop.f32.mrf.mxu0  ;;  %v896_v32 = vpop.f32.mrf.mxu1 }
 0x1ac   :  { %v1008_v19 = vsel %vm1006_vm9, %v1002_v16, %v1007_v17  ;;  %v919_v41 = vmul.f32 %v896_v32, %v805_v9  ;;  %vm915_vm14 = vcmp.ge.f32.partialorder %v896_v32, 0.0  ;;  %v924_v47 = vsel %vm916_vm13, %v1537_v31, %v920_v38 }
 0x1ad   :  { %v1009_v20 = vmul.f32 0.5, %v1008_v19  ;;  %v1540_v33 = vpop.f32.mrf.mxu1  ;;  %v928_v54 = vmul.f32 0.33333334, %v924_v47 }
 0x1ae   :  { %v922_v35 = vmul.f32 %v1540_v33, %v805_v9  ;;  %vm918_vm11 = vcmp.ge.f32.partialorder %v1540_v33, 0.0  ;;  %v923_v53 = vsel %vm915_vm14, %v896_v32, %v919_v41 }
 0x1af   :  { %1554 = vmatprep.subr.mxu0 %v1009_v20  ;;  %v906_v34 = vpop.f32.mrf.mxu1  ;;  %v927_v57 = vmul.f32 0.33333334, %v923_v53 }
 0x1b0   :  { %1555 = vmatpush3.msra.mxu0 %v1009_v20  ;;  %v921_v36 = vmul.f32 %v906_v34, %v805_v9  ;;  %vm917_vm12 = vcmp.ge.f32.partialorder %v906_v34, 0.0  ;;  %v926_v39 = vsel %vm918_vm11, %v1540_v33, %v922_v35 }
 0x1b1   :  { %1557 = vmatmul.mubr.msk.f32.vlgmr.msra.gmra.mxu0 %vm1014_vm6, %v1011_v21  ;;  %v930_v45 = vmul.f32 0.33333334, %v926_v39 }
 0x1b2   :  { %1559 = vmatprep.mubr.msk.f32.mxu0 %vm1014_vm6, %v1012_v22  ;;  %v925_v42 = vsel %vm917_vm12, %v906_v34, %v921_v36 }
 0x1b3   :  { %v929_v49 = vmul.f32 0.33333334, %v925_v42 }
 0x1b5   :  { %1560 = vmatmul.mubr.msk.f32.gmra.mxu0 %vm1014_vm6, %v1013_v23 }
 0x1b6   :  { %1584 = vmatprep.mubr.msk.f32.mxu0 %vm1123_vm10, %v1221_v30 }
 0x271   :  { %v1558_v26 = vpop.f32.mrf.mxu0 }
 0x273   :  { %v1093_v27 = vpop.f32.mrf.mxu0 }
 0x274   :  { %1570 = vmatprep.mubr.msk.f32.mxu1 %vm1123_vm10, %v1093_v27 }
 0x275   :  { %v1561_v28 = vpop.f32.mrf.mxu0  ;;  %1571 = vmatmul.mubr.msk.f32.vlgmr.msra.gmra.mxu1 %vm1123_vm10, %v1558_v26 }
 0x277   :  { %v1103_v29 = vpop.f32.mrf.mxu0 }
 0x278   :  { %1573 = vmatprep.mubr.msk.f32.mxu1 %vm1123_vm10, %v1103_v29 }
 0x279   :  { %1574 = vmatmul.mubr.msk.f32.gmra.mxu1 %vm1123_vm10, %v1561_v28 }
 0x335   :  { %v1572_v37 = vpop.f32.mrf.mxu1 }
 0x336   :  { %v1208_v50 = vadd.f32 %v1572_v37, %v1386_v43 }
 0x337   :  { %v1202_v40 = vpop.f32.mrf.mxu1 }
 0x338   :  { %v1203_v55 = vadd.f32 %v1386_v43, %v1202_v40  ;;  %v1224_v58 = vadd.f32 %v1208_v50, %v928_v54 }
 0x339   :  { %v1575_v44 = vpop.f32.mrf.mxu1 }
 0x33a   :  { %v1218_v46 = vadd.f32 %v1575_v44, %v1386_v43  ;;  %v1223_v59 = vadd.f32 %v1203_v55, %v927_v57 }
 0x33b   :  { %v1212_v48 = vpop.f32.mrf.mxu1 }
 0x33c   :  { %v1226_v51 = vadd.f32 %v1218_v46, %v930_v45  ;;  %v1213_v52 = vadd.f32 %v1386_v43, %v1212_v48 }
 0x33e   :  { %v1225_v56 = vadd.f32 %v1213_v52, %v929_v49  ;;  %1576 = vmatprep.subr.mxu0 %v1226_v51 }
 0x33f   :  { %1577 = vmatpush3.msra.mxu0 %v1226_v51 }
 0x340   :  { %1578 = vmatprep.subr.mxu0 %v1225_v56 }
 0x341   :  { %1579 = vmatpush3.msra.mxu0 %v1225_v56 }
 0x342   :  { %1580 = vmatprep.subr.mxu0 %v1224_v58 }
 0x343   :  { %1581 = vmatpush3.msra.mxu0 %v1224_v58 }
 0x344   :  { %1582 = vmatprep.subr.mxu0 %v1223_v59 }
 0x345   :  { %1583 = vmatpush3.msra.mxu0 %v1223_v59 }
 0x346   :  { %1585 = vmatmul.mubr.msk.f32.vlgmr.msra.gmra.mxu0 %vm1123_vm10, %v1222_v60 }
 0x406   :  { %v1586_v62 = vpop.f32.mrf.mxu0 }
 0x407   :  { %v1309_v63 = vadd.f32 %v1586_v62, %v812_v61 }
 0x408   :  { %v1299_v1 = vpop.f32.mrf.mxu0 }
 0x409   :  { %v1311_v2 = vmul.f32 0.33333334, %v1309_v63  ;;  %v1308_v3 = vadd.f32 %v1299_v1, %v811_v0 }
 0x40b   :  { %1313 = vst.msk [vmem:[#allocation3 + $0x8] sm:$0xff] %vm1123_vm10, %v1311_v2  ;;  %v1310_v4 = vmul.f32 0.33333334, %v1308_v3 }
 0x40d   :  { %1312 = vst.msk [vmem:[#allocation3] sm:$0xff] %vm1123_vm10, %v1310_v4 }
 0x40e   :  { %1605 = shalt.err (!%p1602_p4)
}
 0x40f   :  { %s1620_s16 = smov 128   ;;  %s1621_s2 = smov 8  }
 0x410   :  { %1325 = dma.vmem_to_hbm [thread:$0]  %s1320_s12, 256, %s1895_s13, [#allocation4], %s1620_s16, %s1620_s16, %s1621_s2  }
 0x411   :  { %1614 = dma.done.wait [#allocation4], 256  }
 0x412   :  { %1615 = vsyncadd [#allocation4], 4294967040 }
 0x413   :  { %1329 = vsyncpa [#allocation4], 1 }

</bundles_post_ra>
